<compile_context>
chip_gen: v6e
topology: v6e:2x2x1
jax: 0.10.0
libtpu: 0.0.40
codegen_flags: <defaults>
</compile_context>

<pallas_src>
import functools

import jax
import jax.numpy as jnp
from jax.experimental import pallas as pl
from jax.experimental.pallas import tpu as pltpu

_MiB = 1024 * 1024


def _sublane_pack(itemsize):
    return {4: 8, 2: 16, 1: 32}.get(int(itemsize), 8)


def _vmem_capacity_bytes():
    """Physical VMEM per TensorCore; conservative (v7x, 64 MiB) fallback."""
    try:
        info = pltpu.get_tpu_info()
        for name in ("vmem_capacity_bytes", "vmem_size_bytes", "vmem_bytes"):
            v = getattr(info, name, None)
            if v:
                return int(v)
    except Exception:
        pass
    return 64 * _MiB


# --------------------- single-pass kernel (feature dim un-tiled) ------------

def _cnode0_kernel(x_ref, f_ref, o_ref):
    x = x_ref[...].astype(jnp.float32)             # (TB, N)
    f = f_ref[...].astype(jnp.float32)             # (1, N) broadcasts over rows
    xf = x * f
    xT_fx = jnp.sum(xf, axis=-1, keepdims=True)    # (TB, 1)
    # x*(f - xT_fx) == x*f - x*xT_fx; avoids materializing a broadcast of f.
    o_ref[...] = (xf - x * xT_fx).astype(o_ref.dtype)


# --------------------- two-pass fallback kernels (feature dim tiled) --------

def _cnode0_sum_kernel(x_ref, f_ref, s_ref, *, n_valid, tn):
    k = pl.program_id(1)

    @pl.when(k == 0)
    def _():
        s_ref[...] = jnp.zeros_like(s_ref)

    x = x_ref[...].astype(jnp.float32)             # (TB, TN)
    f = f_ref[...].astype(jnp.float32)             # (1, TN)
    col = k * tn + jax.lax.broadcasted_iota(jnp.int32, x.shape, 1)
    xf = jnp.where(col < n_valid, x * f, 0.0)      # mask ragged feature tail
    s_ref[...] += jnp.sum(xf, axis=-1, keepdims=True)


def _cnode0_scale_kernel(x_ref, f_ref, s_ref, o_ref):
    x = x_ref[...].astype(jnp.float32)             # (TB, TN)
    f = f_ref[...].astype(jnp.float32)             # (1, TN)
    s = s_ref[...]                                 # (TB, 1) f32
    o_ref[...] = (x * (f - s)).astype(o_ref.dtype)


def _cnode0_two_pass(x, f2, *, pipeline_budget, vmem_cap, tn_cap=None, tb_cap=None):
    """Fallback for very large N: tile the feature dim, sum then scale."""
    B, N = x.shape
    itemsize = jnp.dtype(x.dtype).itemsize
    f_itemsize = jnp.dtype(f2.dtype).itemsize
    pack = _sublane_pack(itemsize)

    # Feature tile: multiple of 128 lanes (<= 4096), or full N when N <= 128.
    if N <= 128:
        TN = N
    else:
        TN = 128 * max(1, min(N // 128, 32))
        if tn_cap is not None:
            TN = max(128, min(TN, (tn_cap // 128) * 128))

    # Batch tile: ~4 MiB x tiles, double-buffered x + out within the budget.
    tn_row_bytes = TN * itemsize
    target = min(4 * _MiB, pipeline_budget // 4)
    tb = min(B,
             max(pack, target // tn_row_bytes),
             max(pack, pipeline_budget // (4 * tn_row_bytes)))
    if tb_cap is not None:
        tb = min(tb, tb_cap)
    TB = B if tb >= B else max(pack, (tb // pack) * pack)

    nb, nk = pl.cdiv(B, TB), pl.cdiv(N, TN)

    def _vlim(nbytes):
        return int(min(max(nbytes, 16 * _MiB), vmem_cap))

    # Pass 1: xT_fx = sum(x * f, -1)   (reduction axis last, 'arbitrary')
    vlim1 = _vlim(2 * TB * TN * itemsize + 2 * TN * f_itemsize + 2 * TB * 4 + 2 * _MiB)
    xT_fx = pl.pallas_call(
        functools.partial(_cnode0_sum_kernel, n_valid=N, tn=TN),
        out_shape=jax.ShapeDtypeStruct((B, 1), jnp.float32),
        grid=(nb, nk),
        in_specs=[pl.BlockSpec((TB, TN), lambda i, k: (i, k)),
                  pl.BlockSpec((1, TN), lambda i, k: (0, k))],
        out_specs=pl.BlockSpec((TB, 1), lambda i, k: (i, 0)),
        compiler_params=pltpu.CompilerParams(
            dimension_semantics=("parallel", "arbitrary"),
            vmem_limit_bytes=vlim1),
        cost_estimate=pl.CostEstimate(
            flops=2 * B * N, transcendentals=0,
            bytes_accessed=B * N * itemsize + N * f_itemsize + B * 4),
    )(x, f2)

    # Pass 2: dxdt = x * (f - xT_fx)
    vlim2 = _vlim(4 * TB * TN * itemsize + 2 * TN * f_itemsize + 2 * TB * 4 + 2 * _MiB)
    return pl.pallas_call(
        _cnode0_scale_kernel,
        out_shape=jax.ShapeDtypeStruct((B, N), x.dtype),
        grid=(nb, nk),
        in_specs=[pl.BlockSpec((TB, TN), lambda i, k: (i, k)),
                  pl.BlockSpec((1, TN), lambda i, k: (0, k)),
                  pl.BlockSpec((TB, 1), lambda i, k: (i, 0))],
        out_specs=pl.BlockSpec((TB, TN), lambda i, k: (i, k)),
        compiler_params=pltpu.CompilerParams(
            dimension_semantics=("parallel", "parallel"),
            vmem_limit_bytes=vlim2),
        cost_estimate=pl.CostEstimate(
            flops=2 * B * N, transcendentals=0,
            bytes_accessed=2 * B * N * itemsize + N * f_itemsize + B * 4),
    )(x, f2, xT_fx)


# --------------------------------- wrapper -----------------------------------

def cnode0_forward(x, f, *, tb_cap=None, force_two_pass=False, tn_cap=None):
    """dxdt = x * (f - sum(x * f, -1, keepdims=True)).  x: (B, N), f: (N,)."""
    B, N = x.shape
    assert f.shape == (N,)

    itemsize = jnp.dtype(x.dtype).itemsize
    f_itemsize = jnp.dtype(f.dtype).itemsize
    pack = _sublane_pack(itemsize)
    f2 = f.reshape(1, N)                           # tiny; only reshape needed

    # Per-generation VMEM budget, with headroom (48 MiB on v7x, 112 v5e/v6e).
    phys_vmem = _vmem_capacity_bytes()
    vmem_cap = max(32 * _MiB, phys_vmem - 16 * _MiB)
    pipeline_budget = vmem_cap - 2 * _MiB

    # If even a minimal (pack, N) double-buffered x+out tile cannot fit VMEM,
    # fall back to the feature-tiled two-pass implementation.
    row_bytes = N * itemsize
    if force_two_pass or 4 * pack * row_bytes > pipeline_budget:
        return _cnode0_two_pass(x, f2, pipeline_budget=pipeline_budget,
                                vmem_cap=vmem_cap, tn_cap=tn_cap, tb_cap=tb_cap)

    # Batch tile: aim for an ~8 MiB x tile (amortizes ~0.35 us/step overhead),
    # capped so double-buffered (x + out) tiles fit the pipeline budget, and
    # rounded to the dtype's sublane pack factor.
    target_tile_bytes = min(8 * _MiB, pipeline_budget // 4)
    tb = min(B,
             max(pack, target_tile_bytes // row_bytes),
             max(pack, pipeline_budget // (4 * row_bytes)))
    if tb_cap is not None:
        tb = min(tb, tb_cap)
    TB = B if tb >= B else max(pack, (tb // pack) * pack)

    needed = 4 * TB * row_bytes + 2 * N * f_itemsize + 2 * _MiB
    vmem_limit = int(min(max(needed, 16 * _MiB), vmem_cap))

    # NOTE: f never changes block index; pipeline_mode=pl.Buffered(1) would
    # save one (1, N) buffer, but the VMEM saving is negligible so we keep the
    # portable default.
    # TODO(synk): on v7x verify the 'parallel' batch axis shards across both
    # TensorCores (xprof); if not, switch that axis to pltpu.CORE_PARALLEL.
    return pl.pallas_call(
        _cnode0_kernel,
        out_shape=jax.ShapeDtypeStruct((B, N), x.dtype),
        grid=(pl.cdiv(B, TB),),
        in_specs=[
            pl.BlockSpec((TB, N), lambda i: (i, 0)),   # x tile (pipelined)
            pl.BlockSpec((1, N), lambda i: (0, 0)),    # f: constant block
        ],
        out_specs=pl.BlockSpec((TB, N), lambda i: (i, 0)),
        compiler_params=pltpu.CompilerParams(
            dimension_semantics=("parallel",),
            vmem_limit_bytes=vmem_limit),
        cost_estimate=pl.CostEstimate(
            flops=3 * B * N, transcendentals=0,
            bytes_accessed=2 * B * N * itemsize + N * f_itemsize),
    )(x, f2)


def cnode0_reference(x, f):
    fx = jnp.broadcast_to(f[None, :], x.shape)
    xT_fx = jnp.sum(x * fx, axis=-1, keepdims=True)
    return x * (fx - xT_fx)


if __name__ == "__main__":
    key = jax.random.PRNGKey(0)
    k1, k2, k3, k4, k5, k6, k7, k8 = jax.random.split(key, 8)

    # Case 1: small single-block case (module: f = randn(N), x: (B, N)).
    B, N = 4, 32
    f = jax.random.normal(k1, (N,), dtype=jnp.float32)
    x = jax.random.normal(k2, (B, N), dtype=jnp.float32)
    out = jax.block_until_ready(cnode0_forward(x, f))
    assert out.shape == (B, N)
    assert jnp.allclose(out, cnode0_reference(x, f), atol=1e-5, rtol=1e-5)

    # Case 2: multi-block batch tiling + non-128-multiple feature dim (no pad).
    B2, N2 = 24, 160
    f_b = jax.random.normal(k3, (N2,), dtype=jnp.float32)
    x_b = jax.random.normal(k4, (B2, N2), dtype=jnp.float32)
    out_b = jax.block_until_ready(cnode0_forward(x_b, f_b, tb_cap=8))
    assert out_b.shape == (B2, N2)
    assert jnp.allclose(out_b, cnode0_reference(x_b, f_b), atol=1e-4, rtol=1e-4)

    # Case 3: forced two-pass (feature-tiled) fallback incl. ragged N tail.
    B3, N3 = 10, 200
    f_c = jax.random.normal(k5, (N3,), dtype=jnp.float32)
    x_c = jax.random.normal(k6, (B3, N3), dtype=jnp.float32)
    out_c = jax.block_until_ready(
        cnode0_forward(x_c, f_c, force_two_pass=True, tn_cap=128))
    assert out_c.shape == (B3, N3)
    assert jnp.allclose(out_c, cnode0_reference(x_c, f_c), atol=1e-4, rtol=1e-4)

    # Case 4: bf16 input (dtype-aware tile sizing / sublane pack factor).
    B4, N4 = 16, 256
    f_d = jax.random.normal(k7, (N4,), dtype=jnp.float32).astype(jnp.bfloat16)
    x_d = jax.random.normal(k8, (B4, N4), dtype=jnp.float32).astype(jnp.bfloat16)
    out_d = jax.block_until_ready(cnode0_forward(x_d, f_d))
    ref_d = cnode0_reference(x_d.astype(jnp.float32), f_d.astype(jnp.float32))
    assert out_d.shape == (B4, N4)
    assert jnp.allclose(out_d.astype(jnp.float32), ref_d, atol=0.25, rtol=5e-2)

    print("KERNEL_OK")
</pallas_src>

<mosaic_0001>
module attributes {stable_mosaic.version = 11 : i64} {
  func.func @_cnode0_kernel(%arg0: i32, %arg1: memref<4x32xf32, #tpu.memory_space<vmem>>, %arg2: memref<1x32xf32, #tpu.memory_space<vmem>>, %arg3: memref<4x32xf32, #tpu.memory_space<vmem>>) attributes {dimension_semantics = [#tpu.dimension_semantics<parallel>], iteration_bounds = array<i64: 1>, scalar_prefetch = 0 : i64, scratch_operands = 0 : i64, tpu.core_type = #tpu.core_type<tc>, window_params = [{transform_indices = @transform_0, window_bounds = array<i64: 4, 32>}, {pipeline_mode = #tpu.pipeline_mode<synchronous>, transform_indices = @transform_1, window_bounds = array<i64: 1, 32>}, {transform_indices = @transform_2, window_bounds = array<i64: 4, 32>}]} {
    %c0 = arith.constant 0 : index
    %c0_0 = arith.constant 0 : index
    %0 = vector.load %arg1[%c0, %c0_0] : memref<4x32xf32, #tpu.memory_space<vmem>>, vector<4x32xf32>
    %c0_1 = arith.constant 0 : index
    %c0_2 = arith.constant 0 : index
    %1 = vector.load %arg2[%c0_1, %c0_2] : memref<1x32xf32, #tpu.memory_space<vmem>>, vector<1x32xf32>
    %2 = vector.broadcast %1 : vector<1x32xf32> to vector<4x32xf32>
    %3 = arith.mulf %0, %2 : vector<4x32xf32>
    %cst = arith.constant dense<0.000000e+00> : vector<4xf32>
    %4 = vector.multi_reduction <add>, %3, %cst [1] : vector<4x32xf32> to vector<4xf32>
    %5 = vector.shape_cast %4 : vector<4xf32> to vector<4x1xf32>
    %6 = vector.broadcast %5 : vector<4x1xf32> to vector<4x32xf32>
    %7 = arith.mulf %0, %6 : vector<4x32xf32>
    %8 = arith.subf %3, %7 : vector<4x32xf32>
    %c0_3 = arith.constant 0 : index
    %c0_4 = arith.constant 0 : index
    %9 = vector.load %arg3[%c0_3, %c0_4] : memref<4x32xf32, #tpu.memory_space<vmem>>, vector<4x32xf32>
    tpu.vector_store %arg3[%c0_3, %c0_4], %8 {strides = array<i32>} : memref<4x32xf32, #tpu.memory_space<vmem>>, vector<4x32xf32>,
    return
  }
  func.func @transform_0(%arg0: i32) -> (i32, i32) {
    %c0_i32 = arith.constant 0 : i32
    %c0_i32_0 = arith.constant 0 : i32
    return %arg0, %c0_i32 : i32, i32
  }
  func.func @transform_1(%arg0: i32) -> (i32, i32) {
    %c0_i32 = arith.constant 0 : i32
    %c0_i32_0 = arith.constant 0 : i32
    %c0_i32_1 = arith.constant 0 : i32
    return %c0_i32, %c0_i32_0 : i32, i32
  }
  func.func @transform_2(%arg0: i32) -> (i32, i32) {
    %c0_i32 = arith.constant 0 : i32
    %c0_i32_0 = arith.constant 0 : i32
    return %arg0, %c0_i32 : i32, i32
  }
}

</mosaic_0001>

<bundles_post_ra>
// kernel: tpu_custom_call.1
= control target key start
LH: loop header
LB: loop body
LE: loop exit
PB: predicated region body
PF: predicated region fallthrough
CT: control target
= control target key end

     0   :  { %7 = vsyncpa [#allocation3], 0  ;;  %s128_s0 = inlined_call_operand.hbm [shape: f32[4,32], index: 0, kind: input, shape index: {}]   ;;  %s129_s1 = inlined_call_operand.vmem [shape: f32[1,32], index: 1, kind: input, shape index: {}]   ;;  %s130_s2 = inlined_call_operand.hbm [shape: f32[4,32], index: 2, kind: output, shape index: {}]  }
   0x1   :  { %8 = vsyncpa [#allocation4], 0  ;;  %s102_s9 = smov [#allocation2]  }
   0x2   :  { %s15_s10 = sshll.u32 %s102_s9, 4  ;;  %s16_s10 = int_to_ptr.vmem [resolvable:$true] %s15_s10 }
   0x3   :  { %s66_s11 = scalar_lea.vmem %s16_s10, 64  ;;  %p71_p1 = scmp.lt.s32.totalorder %s16_s10, %s16_s10 }
   0x4   :  { %p67_p0 = scmp.ne.s32.totalorder %s16_s10, %s66_s11  ;;  %p72_p2 = scmp.lt.s32.totalorder %s66_s11, %s66_s11 }
   0x6   :  { %p73_p3 = por %p72_p2, %p71_p1 }
   0x8   :  { %p74_p4 = pnand %p73_p3, %p67_p0 }
   0xa   :  { %77 = shalt.err (!%p74_p4)
}
   0xb   :  { %18 = dma.hbm_to_vmem [thread:$0]  %s128_s0, 64, %s16_s10, [#allocation3]  }
   0xc   :  { %98 = dma.done.wait [#allocation3], 64  }
   0xd   :  { %99 = vsyncadd [#allocation3], 4294967232  ;;  %v24_v0 = vld [vmem:[#allocation2] sm:$0xf]  ;;  %vm33_vm0 = vcmask 257024   ;;  %s103_s16 = smov [#allocation5]  }
   0xe   :  { %v55_v1 = vld [vmem:[%s129_s1] ss:$0 sm:$0xff]  ;;  %s46_s17 = sshll.u32 %s103_s16, 4  ;;  %s47_s17 = int_to_ptr.vmem [resolvable:$true] %s46_s17 }
   0xf   :  { %v32_v2 = vmul.f32 %v55_v1, %v24_v0  ;;  %s78_s18 = scalar_lea.vmem %s47_s17, 64  ;;  %p83_p6 = scmp.lt.s32.totalorder %s47_s17, %s47_s17 }
  0x10   :  { %p79_p5 = scmp.ne.s32.totalorder %s47_s17, %s78_s18  ;;  %p84_p7 = scmp.lt.s32.totalorder %s78_s18, %s78_s18 }
  0x11   :  { %v34_v3 = vsel %vm33_vm0, %v32_v2, 0.0 }
  0x12   :  { %35 = vadd.xlane.f32.xlu0 %v34_v3  ;;  %p85_p8 = por %p84_p7, %p83_p6 }
  0x14   :  { %p86_p9 = pnand %p85_p8, %p79_p5 }
  0x9b   :  { %v36_v4 = vpop.xlane.xlu0 %35 }
  0x9c   :  { %v37_v5 = vmul.f32 %v36_v4, %v24_v0 }
  0x9e   :  { %v38_v6 = vsub.f32 %v32_v2, %v37_v5 }
  0xa0   :  { %39 = vst.msk [vmem:[#allocation5] sm:$0xf] %vm33_vm0, %v38_v6 }
  0xa1   :  { %89 = shalt.err (!%p86_p9)
}
  0xa2   :  { %49 = dma.vmem_to_hbm [thread:$0]  %s47_s17, 64, %s130_s2, [#allocation4]  }
  0xa3   :  { %100 = dma.done.wait [#allocation4], 64  }
  0xa4   :  { %101 = vsyncadd [#allocation4], 4294967232 }
  0xa5   :  { %53 = vsyncpa [#allocation3], 1 }
  0xa6   :  { %54 = vsyncpa [#allocation4], 1 }

</bundles_post_ra>
